<compile_context>
chip_gen: v7x
topology: tpu7x:2x2x1
jax: 0.10.0
libtpu: 0.0.40
codegen_flags: <defaults>
</compile_context>

<pallas_src>
import math

import jax
import jax.numpy as jnp
from jax.experimental import pallas as pl
from jax.experimental.pallas import tpu as pltpu


def _identity_kernel(x_ref, o_ref):
    # DummyLayerNorm.forward(x) == x → straight lane-dense VMEM tile copy.
    o_ref[...] = x_ref[...]


def _identity_pallas(x):
    """Identity implemented as a Pallas TPU copy kernel."""
    orig_shape = x.shape
    if x.ndim == 0:
        x = x.reshape(1, 1)
    hidden = x.shape[-1]
    rows = math.prod(x.shape[:-1]) if x.ndim > 1 else 1
    x2d = x.reshape(rows, hidden)

    # Small input: single whole-array block, no grid, input aliased to output.
    if rows <= 1024:
        out2d = pl.pallas_call(
            _identity_kernel,
            out_shape=jax.ShapeDtypeStruct((rows, hidden), x2d.dtype),
            in_specs=[pl.BlockSpec(memory_space=pltpu.MemorySpace.VMEM)],
            out_specs=pl.BlockSpec(memory_space=pltpu.MemorySpace.VMEM),
            input_output_aliases={0: 0},
        )(x2d)
        return out2d.reshape(orig_shape)

    # Scaled-up path (real GPT-2 activation sizes): tile the row axis.
    # 512 rows x hidden f32 per block keeps double-buffered in+out well under
    # the v7x 32 MiB scoped VMEM limit while amortizing per-step overhead.
    # NOTE: for bf16 inputs keep the row tile a multiple of 16 (512 is).
    tile_rows = 512
    out2d = pl.pallas_call(
        _identity_kernel,
        out_shape=jax.ShapeDtypeStruct((rows, hidden), x2d.dtype),
        grid=(pl.cdiv(rows, tile_rows),),
        in_specs=[pl.BlockSpec((tile_rows, hidden), lambda i: (i, 0))],
        out_specs=pl.BlockSpec((tile_rows, hidden), lambda i: (i, 0)),
        input_output_aliases={0: 0},
        compiler_params=pltpu.CompilerParams(
            dimension_semantics=("parallel",),
        ),
    )(x2d)
    return out2d.reshape(orig_shape)


def dummy_layer_norm(x, normalized_shape=None, eps=1e-5, *, force_pallas=False):
    """Pallas-flavored DummyLayerNorm.forward (identity).

    normalized_shape / eps are accepted for API parity with the PyTorch
    module but unused (the module defines no parameters).

    By default this returns x unchanged — the semantically identical
    zero-cost path (no kernel launch, no HBM round-trip). Pass
    force_pallas=True to route the data through the Pallas copy kernel.
    """
    if not force_pallas:
        return x
    return _identity_pallas(x)


if __name__ == "__main__":
    key = jax.random.PRNGKey(0)
    # Matches the module's example input: torch.rand(2, 4, 768)
    x = jax.random.uniform(key, (2, 4, 768), dtype=jnp.float32)

    # Zero-cost default path (recommended): identity, no kernel launch.
    y_fast = dummy_layer_norm(x, normalized_shape=768)

    # Pallas path, exercised once on TPU.
    y = dummy_layer_norm(x, normalized_shape=768, force_pallas=True)
    y = jax.block_until_ready(y)

    assert y.shape == x.shape
    assert y.dtype == x.dtype
    assert bool(jnp.array_equal(y, x))       # identity semantics (kernel)
    assert bool(jnp.array_equal(y_fast, x))  # identity semantics (fast path)

    print("KERNEL_OK")
</pallas_src>

<mosaic_0001>
module attributes {stable_mosaic.version = 11 : i64} {
  func.func @_identity_kernel(%arg0: memref<8x768xf32, #tpu.memory_space<vmem>>, %arg1: memref<8x768xf32, #tpu.memory_space<vmem>>) attributes {dimension_semantics = [], scalar_prefetch = 0 : i64, scratch_operands = 0 : i64, tpu.core_type = #tpu.core_type<tc>} {
    %c0 = arith.constant 0 : index
    %c0_0 = arith.constant 0 : index
    %0 = vector.load %arg0[%c0, %c0_0] : memref<8x768xf32, #tpu.memory_space<vmem>>, vector<8x768xf32>
    %c0_1 = arith.constant 0 : index
    %c0_2 = arith.constant 0 : index
    %1 = vector.load %arg1[%c0_1, %c0_2] : memref<8x768xf32, #tpu.memory_space<vmem>>, vector<8x768xf32>
    tpu.vector_store %arg1[%c0_1, %c0_2], %0 {strides = array<i32>} : memref<8x768xf32, #tpu.memory_space<vmem>>, vector<8x768xf32>,
    return
  }
}

</mosaic_0001>

<bundles_post_ra>
// kernel: tpu_custom_call.1
= control target key start
LH: loop header
LB: loop body
LE: loop exit
PB: predicated region body
PF: predicated region fallthrough
CT: control target
= control target key end

     0   :  { %6 = vsyncpa [#allocation3], 0  ;;  %s134_s0 = inlined_call_operand.hbm [shape: f32[8,768], index: 0, kind: input, shape index: {}, may-alias: {0,1}]   ;;  %s135_s1 = inlined_call_operand.hbm [shape: f32[8,768], index: 1, kind: output, shape index: {}, may-alias: {0,1}]  }
   0x1   :  { %7 = vsyncpa [#allocation4], 0  ;;  %s98_s6 = smov [#allocation2]   ;;  %s50_s10 = scalar_lea.hbm %s134_s0, 768 }
   0x2   :  { %s14_s7 = sshll.u32 %s98_s6, 4  ;;  %p51_p0 = scmp.ne.s32.totalorder %s134_s0, %s50_s10  ;;  %s15_s7 = int_to_ptr.vmem [resolvable:$true] %s14_s7 }
   0x3   :  { %p54_p1 = scmp.lt.u32.totalorder %s50_s10, %s134_s0 }
   0x5   :  { %p56_p2 = pnand %p54_p1, %p51_p0 }
   0x7   :  { %59 = shalt.err (!%p56_p2)
}
   0x8   :  { %s60_s15 = scalar_lea.vmem %s15_s7, 768  ;;  %p65_p4 = scmp.lt.s32.totalorder %s15_s7, %s15_s7 }
   0x9   :  { %p61_p3 = scmp.ne.s32.totalorder %s15_s7, %s60_s15  ;;  %p66_p5 = scmp.lt.s32.totalorder %s60_s15, %s60_s15 }
   0xb   :  { %p67_p6 = por %p66_p5, %p65_p4 }
   0xd   :  { %p68_p7 = pnand %p67_p6, %p61_p3 }
   0xf   :  { %71 = shalt.err (!%p68_p7)
}
  0x10   :  { %17 = dma.hbm_to_vmem [thread:$0]  %s134_s0, 768, %s15_s7, [#allocation3]  }
  0x11   :  { %94 = dma.done.wait [#allocation3], 768  }
  0x12   :  { %95 = vsyncadd [#allocation3], 4294966528  ;;  %s99_s18 = smov [#allocation5]   ;;  %v21_v0 = vld [vmem:[#allocation2] sm:$0xff]  ;;  %v22_v1 = vld [vmem:[#allocation2 + $0x8] sm:$0xff] }
  0x13   :  { %s39_s19 = sshll.u32 %s99_s18, 4  ;;  %v23_v2 = vld [vmem:[#allocation2 + $0x10] sm:$0xff]  ;;  %27 = vst [vmem:[#allocation5] sm:$0xff] %v21_v0  ;;  %28 = vst [vmem:[#allocation5 + $0x8] sm:$0xff] %v22_v1  ;;  %v24_v3 = vld [vmem:[#allocation2 + $0x18] sm:$0xff]  ;;  %s40_s19 = int_to_ptr.vmem [resolvable:$true] %s39_s19 }
  0x14   :  { %29 = vst [vmem:[#allocation5 + $0x10] sm:$0xff] %v23_v2  ;;  %v25_v4 = vld [vmem:[#allocation2 + $0x20] sm:$0xff]  ;;  %v26_v5 = vld [vmem:[#allocation2 + $0x28] sm:$0xff]  ;;  %30 = vst [vmem:[#allocation5 + $0x18] sm:$0xff] %v24_v3  ;;  %s72_s20 = scalar_lea.vmem %s40_s19, 768  ;;  %p77_p9 = scmp.lt.s32.totalorder %s40_s19, %s40_s19 }
  0x15   :  { %31 = vst [vmem:[#allocation5 + $0x20] sm:$0xff] %v25_v4  ;;  %32 = vst [vmem:[#allocation5 + $0x28] sm:$0xff] %v26_v5  ;;  %p73_p8 = scmp.ne.s32.totalorder %s40_s19, %s72_s20  ;;  %p78_p10 = scmp.lt.s32.totalorder %s72_s20, %s72_s20 }
  0x17   :  { %p79_p11 = por %p78_p10, %p77_p9 }
  0x19   :  { %p80_p12 = pnand %p79_p11, %p73_p8 }
  0x1b   :  { %83 = shalt.err (!%p80_p12)
}
  0x1c   :  { %s84_s22 = scalar_lea.hbm %s135_s1, 768 }
  0x1d   :  { %p85_p13 = scmp.ne.s32.totalorder %s135_s1, %s84_s22  ;;  %p88_p0 = scmp.lt.u32.totalorder %s84_s22, %s135_s1 }
  0x1f   :  { %p90_p1 = pnand %p88_p0, %p85_p13 }
  0x21   :  { %93 = shalt.err (!%p90_p1)
}
  0x22   :  { %42 = dma.vmem_to_hbm [thread:$0]  %s40_s19, 768, %s135_s1, [#allocation4]  }
  0x23   :  { %96 = dma.done.wait [#allocation4], 768  }
  0x24   :  { %97 = vsyncadd [#allocation4], 4294966528 }
  0x25   :  { %46 = vsyncpa [#allocation3], 1 }
  0x26   :  { %47 = vsyncpa [#allocation4], 1 }

</bundles_post_ra>
